<compile_context>
chip_gen: v7x
topology: tpu7x:2x2x1
jax: 0.10.0
libtpu: 0.0.40
codegen_flags: <defaults>
</compile_context>

<pallas_src>
import math
import numpy as np
import jax
import jax.numpy as jnp
from jax.experimental import pallas as pl
from jax.experimental.pallas import tpu as pltpu


# ----------------------------------------------------------------------------
# layergen / build_mlp equivalents (pure Python glue, matches torch.logspace)
# ----------------------------------------------------------------------------
def layergen(input_dim, output_dim, nlayers=1, midmult=1.0):
    midlayersize = midmult * (input_dim + output_dim) // 2
    midlayersize = max(midlayersize, 1)
    nlayers += 2
    layers1 = np.round(
        np.logspace(math.log10(input_dim), math.log10(midlayersize), num=nlayers // 2)
    ).astype(np.int64)
    layers2 = np.round(
        np.logspace(math.log10(midlayersize), math.log10(output_dim), num=(nlayers + 1) // 2)
    ).astype(np.int64)[1:]
    return [int(v) for v in np.concatenate([layers1, layers2])]


def _round_up(a, m):
    return (a + m - 1) // m * m


# ----------------------------------------------------------------------------
# Pallas kernel: fused 3-layer MLP over all k nets, per batch tile
# ----------------------------------------------------------------------------
def _mish_fast(x):
    # mish(x) = x * tanh(softplus(x)) = x * (e^2 + 2e) / (e^2 + 2e + 2), e=exp(x).
    # Single EUP exp; the divide lowers to one EUP reciprocal + VALU refine
    # (the VALU slots have slack, so this matches approx-reciprocal throughput).
    e = jnp.exp(jnp.minimum(x, 20.0))
    n = e * (e + 2.0)
    t = n / (n + 2.0)
    return jnp.where(x > 20.0, x, x * t)


def integral_kernel(x_ref, w1_ref, b1_ref, w2_ref, b2_ref, w3_ref, b3_ref, o_ref):
    x = x_ref[...].astype(jnp.float32)
    # Layer 1: all k nets fused along the output dim.
    h = _mish_fast(
        jnp.dot(x, w1_ref[...], preferred_element_type=jnp.float32) + b1_ref[...]
    )
    # Layer 2: block-diagonal fused weights (per-net independence preserved).
    h = _mish_fast(
        jnp.dot(h, w2_ref[...], preferred_element_type=jnp.float32) + b2_ref[...]
    )
    # Layer 3 + cat/sum(dim=-1): pre-folded into a single matvec + scalar bias.
    y = jnp.dot(h, w3_ref[...], preferred_element_type=jnp.float32) + b3_ref[...]
    o_ref[...] = y.astype(o_ref.dtype)


def integral_network_forward(x, fused_params, *, batch_tile=512):
    """x: [B, D_in].  fused_params from pack_params().  Returns [B, 1]."""
    B, D = x.shape
    w1, b1, w2, b2, w3v, b3s = fused_params
    K1 = w1.shape[1]
    K2 = w2.shape[1]

    # Tile choice: multiple of 8, at most the requested tile, and small enough
    # to give >= 2 grid iterations when B allows (v7x: 2 TensorCores).
    bt = max(8, min(_round_up(batch_tile, 8), _round_up((B + 1) // 2, 8)))
    Bp = _round_up(B, bt)
    xp = jnp.pad(x, ((0, Bp - B), (0, 0))) if Bp != B else x
    grid = (Bp // bt,)

    out = pl.pallas_call(
        integral_kernel,
        out_shape=jax.ShapeDtypeStruct((Bp, 1), x.dtype),
        grid_spec=pltpu.PrefetchScalarGridSpec(
            num_scalar_prefetch=0,
            grid=grid,
            in_specs=[
                pl.BlockSpec((bt, D), lambda b: (b, 0)),      # x tile
                pl.BlockSpec((D, K1), lambda b: (0, 0)),      # W1 fused  [D, k*d1]
                pl.BlockSpec((1, K1), lambda b: (0, 0)),      # b1 fused
                pl.BlockSpec((K1, K2), lambda b: (0, 0)),     # W2 block-diag
                pl.BlockSpec((1, K2), lambda b: (0, 0)),      # b2 fused
                pl.BlockSpec((K2, 1), lambda b: (0, 0)),      # W3 pre-summed matvec
                pl.BlockSpec((1, 1), lambda b: (0, 0)),       # total layer-3 bias
            ],
            out_specs=pl.BlockSpec((bt, 1), lambda b: (b, 0)),
        ),
        compiler_params=pltpu.CompilerParams(
            dimension_semantics=("parallel",),
            vmem_limit_bytes=32 * 1024 * 1024,
        ),
    )(xp, w1, b1, w2, b2, w3v, b3s)
    return out[:B]


# ----------------------------------------------------------------------------
# Parameter init (kaiming_normal_ weights, Linear-style biases) and packing
# ----------------------------------------------------------------------------
def init_params(key, layer_sizes, k):
    dims = list(zip(layer_sizes[:-1], layer_sizes[1:]))
    params = []
    keys = jax.random.split(key, len(dims))
    for j, (fan_in, fan_out) in enumerate(dims):
        kw, kb = jax.random.split(keys[j])
        # kaiming_normal_(mode='fan_in', gain=sqrt(2)); stored as [k, in, out]
        w = jax.random.normal(kw, (k, fan_in, fan_out), jnp.float32) * math.sqrt(2.0 / fan_in)
        bound = 1.0 / math.sqrt(fan_in)
        b = jax.random.uniform(kb, (k, 1, fan_out), jnp.float32, minval=-bound, maxval=bound)
        params.append((w, b))
    return params


def pack_params(params):
    """Fuse the k nets: concat layer-1, block-diag layer-2, fold layer-3 + sum."""
    (w1, b1), (w2, b2), (w3, b3) = params
    k, D, d1 = w1.shape
    d2 = w2.shape[-1]
    K1, K2 = k * d1, k * d2

    W1 = jnp.transpose(w1, (1, 0, 2)).reshape(D, K1)       # [D, k*d1]
    B1 = b1.reshape(1, K1)                                  # [1, k*d1]

    W2 = jnp.zeros((K1, K2), jnp.float32)                   # block-diagonal
    for i in range(k):
        W2 = W2.at[i * d1:(i + 1) * d1, i * d2:(i + 1) * d2].set(w2[i])
    B2 = b2.reshape(1, K2)                                   # [1, k*d2]

    W3v = jnp.sum(w3, axis=-1).reshape(K2, 1)                # [k*d2, 1] = W3 @ ones
    B3 = jnp.sum(b3).reshape(1, 1)                           # scalar total bias
    return W1, B1, W2, B2, W3v, B3


# ----------------------------------------------------------------------------
# Pure-JAX reference (faithful per-net form; f32 stand-in for torch's f64)
# ----------------------------------------------------------------------------
def _mish_ref(x):
    sp = jnp.where(x > 20.0, x, jnp.log1p(jnp.exp(jnp.minimum(x, 20.0))))
    return x * jnp.tanh(sp)


def reference_forward(x, params):
    (w1, b1), (w2, b2), (w3, b3) = params
    xf = x.astype(jnp.float32)
    outs = []
    for i in range(w1.shape[0]):
        h = _mish_ref(xf @ w1[i] + b1[i])
        h = _mish_ref(h @ w2[i] + b2[i])
        outs.append(h @ w3[i] + b3[i])
    cat = jnp.concatenate(outs, axis=-1)
    return jnp.sum(cat, axis=-1, keepdims=True).astype(x.dtype)


if __name__ == "__main__":
    input_dim, output_dim, k = 8, 4, 2
    B = 200  # deliberately not a multiple of the tile: exercises padding path

    # layergen(8, 4, nlayers=3, midmult=4.0) -> [8, 24, 10, 4]
    layer_sizes = layergen(input_dim, output_dim, nlayers=3, midmult=4.0)
    assert len(layer_sizes) == 4

    key = jax.random.PRNGKey(0)
    kx, kp = jax.random.split(key)
    x = jax.random.normal(kx, (B, input_dim), jnp.float32)
    params = init_params(kp, layer_sizes, k)
    fused = pack_params(params)

    out = integral_network_forward(x, fused, batch_tile=512)
    out = jax.block_until_ready(out)

    ref = reference_forward(x, params)
    assert out.shape == (B, 1), out.shape
    assert out.dtype == x.dtype, out.dtype
    # Precision contract: f32 compute (torch uses f64) + fused summation order;
    # differences are ~1e-6 relative, so 1e-3 is a comfortable correctness gate.
    if not jnp.allclose(out, ref, atol=1e-3, rtol=1e-3):
        maxerr = float(jnp.max(jnp.abs(out - ref)))
        raise AssertionError(f"kernel mismatch: max abs err {maxerr}")

    print("KERNEL_OK")
</pallas_src>

<mosaic_0001>
module attributes {stable_mosaic.version = 11 : i64} {
  func.func @integral_kernel(%arg0: i32, %arg1: memref<104x8xf32, #tpu.memory_space<vmem>>, %arg2: memref<8x48xf32, #tpu.memory_space<vmem>>, %arg3: memref<1x48xf32, #tpu.memory_space<vmem>>, %arg4: memref<48x20xf32, #tpu.memory_space<vmem>>, %arg5: memref<1x20xf32, #tpu.memory_space<vmem>>, %arg6: memref<20x1xf32, #tpu.memory_space<vmem>>, %arg7: memref<1x1xf32, #tpu.memory_space<vmem>>, %arg8: memref<104x1xf32, #tpu.memory_space<vmem>>) attributes {dimension_semantics = [#tpu.dimension_semantics<parallel>], iteration_bounds = array<i64: 2>, scalar_prefetch = 0 : i64, scratch_operands = 0 : i64, tpu.core_type = #tpu.core_type<tc>, window_params = [{transform_indices = @transform_0, window_bounds = array<i64: 104, 8>}, {pipeline_mode = #tpu.pipeline_mode<synchronous>, transform_indices = @transform_1, window_bounds = array<i64: 8, 48>}, {pipeline_mode = #tpu.pipeline_mode<synchronous>, transform_indices = @transform_2, window_bounds = array<i64: 1, 48>}, {pipeline_mode = #tpu.pipeline_mode<synchronous>, transform_indices = @transform_3, window_bounds = array<i64: 48, 20>}, {pipeline_mode = #tpu.pipeline_mode<synchronous>, transform_indices = @transform_4, window_bounds = array<i64: 1, 20>}, {pipeline_mode = #tpu.pipeline_mode<synchronous>, transform_indices = @transform_5, window_bounds = array<i64: 20, 1>}, {pipeline_mode = #tpu.pipeline_mode<synchronous>, transform_indices = @transform_6, window_bounds = array<i64: 1, 1>}, {transform_indices = @transform_7, window_bounds = array<i64: 104, 1>}]} {
    %c0 = arith.constant 0 : index
    %c0_0 = arith.constant 0 : index
    %0 = vector.load %arg1[%c0, %c0_0] : memref<104x8xf32, #tpu.memory_space<vmem>>, vector<104x8xf32>
    %c0_1 = arith.constant 0 : index
    %c0_2 = arith.constant 0 : index
    %1 = vector.load %arg2[%c0_1, %c0_2] : memref<8x48xf32, #tpu.memory_space<vmem>>, vector<8x48xf32>
    %cst = arith.constant dense<0.000000e+00> : vector<104x48xf32>
    %2 = tpu.matmul %0, %1, %cst {dimension_numbers = #tpu.dot_dimension_numbers<[1], [0], [0], [1], [0, 0, 1, 1], [], []>} : vector<104x8xf32>, vector<8x48xf32>, vector<104x48xf32> -> vector<104x48xf32>
    %c0_3 = arith.constant 0 : index
    %c0_4 = arith.constant 0 : index
    %3 = vector.load %arg3[%c0_3, %c0_4] : memref<1x48xf32, #tpu.memory_space<vmem>>, vector<1x48xf32>
    %4 = vector.broadcast %3 : vector<1x48xf32> to vector<104x48xf32>
    %5 = arith.addf %2, %4 : vector<104x48xf32>
    %cst_5 = arith.constant 2.000000e+01 : f32
    %6 = vector.broadcast %cst_5 : f32 to vector<104x48xf32>
    %7 = arith.minimumf %5, %6 : vector<104x48xf32>
    %8 = math.exp %7 : vector<104x48xf32>
    %cst_6 = arith.constant 2.000000e+00 : f32
    %9 = vector.broadcast %cst_6 : f32 to vector<104x48xf32>
    %10 = arith.addf %8, %9 : vector<104x48xf32>
    %11 = arith.mulf %8, %10 : vector<104x48xf32>
    %cst_7 = arith.constant 2.000000e+00 : f32
    %12 = vector.broadcast %cst_7 : f32 to vector<104x48xf32>
    %13 = arith.addf %11, %12 : vector<104x48xf32>
    %14 = arith.divf %11, %13 : vector<104x48xf32>
    %cst_8 = arith.constant 2.000000e+01 : f32
    %15 = vector.broadcast %cst_8 : f32 to vector<104x48xf32>
    %16 = arith.cmpf ogt, %5, %15 : vector<104x48xf32>
    %17 = arith.mulf %5, %14 : vector<104x48xf32>
    %18 = arith.select %16, %5, %17 : vector<104x48xi1>, vector<104x48xf32>
    %c0_9 = arith.constant 0 : index
    %c0_10 = arith.constant 0 : index
    %19 = vector.load %arg4[%c0_9, %c0_10] : memref<48x20xf32, #tpu.memory_space<vmem>>, vector<48x20xf32>
    %cst_11 = arith.constant dense<0.000000e+00> : vector<104x20xf32>
    %20 = tpu.matmul %18, %19, %cst_11 {dimension_numbers = #tpu.dot_dimension_numbers<[1], [0], [0], [1], [0, 0, 1, 1], [], []>} : vector<104x48xf32>, vector<48x20xf32>, vector<104x20xf32> -> vector<104x20xf32>
    %c0_12 = arith.constant 0 : index
    %c0_13 = arith.constant 0 : index
    %21 = vector.load %arg5[%c0_12, %c0_13] : memref<1x20xf32, #tpu.memory_space<vmem>>, vector<1x20xf32>
    %22 = vector.broadcast %21 : vector<1x20xf32> to vector<104x20xf32>
    %23 = arith.addf %20, %22 : vector<104x20xf32>
    %cst_14 = arith.constant 2.000000e+01 : f32
    %24 = vector.broadcast %cst_14 : f32 to vector<104x20xf32>
    %25 = arith.minimumf %23, %24 : vector<104x20xf32>
    %26 = math.exp %25 : vector<104x20xf32>
    %cst_15 = arith.constant 2.000000e+00 : f32
    %27 = vector.broadcast %cst_15 : f32 to vector<104x20xf32>
    %28 = arith.addf %26, %27 : vector<104x20xf32>
    %29 = arith.mulf %26, %28 : vector<104x20xf32>
    %cst_16 = arith.constant 2.000000e+00 : f32
    %30 = vector.broadcast %cst_16 : f32 to vector<104x20xf32>
    %31 = arith.addf %29, %30 : vector<104x20xf32>
    %32 = arith.divf %29, %31 : vector<104x20xf32>
    %cst_17 = arith.constant 2.000000e+01 : f32
    %33 = vector.broadcast %cst_17 : f32 to vector<104x20xf32>
    %34 = arith.cmpf ogt, %23, %33 : vector<104x20xf32>
    %35 = arith.mulf %23, %32 : vector<104x20xf32>
    %36 = arith.select %34, %23, %35 : vector<104x20xi1>, vector<104x20xf32>
    %c0_18 = arith.constant 0 : index
    %c0_19 = arith.constant 0 : index
    %37 = vector.load %arg6[%c0_18, %c0_19] : memref<20x1xf32, #tpu.memory_space<vmem>>, vector<20x1xf32>
    %cst_20 = arith.constant dense<0.000000e+00> : vector<104x1xf32>
    %38 = tpu.matmul %36, %37, %cst_20 {dimension_numbers = #tpu.dot_dimension_numbers<[1], [0], [0], [1], [0, 0, 1, 1], [], []>} : vector<104x20xf32>, vector<20x1xf32>, vector<104x1xf32> -> vector<104x1xf32>
    %c0_21 = arith.constant 0 : index
    %c0_22 = arith.constant 0 : index
    %39 = vector.load %arg7[%c0_21, %c0_22] : memref<1x1xf32, #tpu.memory_space<vmem>>, vector<1x1xf32>
    %40 = vector.broadcast %39 : vector<1x1xf32> to vector<104x1xf32>
    %41 = arith.addf %38, %40 : vector<104x1xf32>
    %c0_23 = arith.constant 0 : index
    %c0_24 = arith.constant 0 : index
    %42 = vector.load %arg8[%c0_23, %c0_24] : memref<104x1xf32, #tpu.memory_space<vmem>>, vector<104x1xf32>
    tpu.vector_store %arg8[%c0_23, %c0_24], %41 {strides = array<i32>} : memref<104x1xf32, #tpu.memory_space<vmem>>, vector<104x1xf32>,
    return
  }
  func.func @transform_0(%arg0: i32) -> (i32, i32) {
    %c0_i32 = arith.constant 0 : i32
    %c0_i32_0 = arith.constant 0 : i32
    return %arg0, %c0_i32 : i32, i32
  }
  func.func @transform_1(%arg0: i32) -> (i32, i32) {
    %c0_i32 = arith.constant 0 : i32
    %c0_i32_0 = arith.constant 0 : i32
    %c0_i32_1 = arith.constant 0 : i32
    return %c0_i32, %c0_i32_0 : i32, i32
  }
  func.func @transform_2(%arg0: i32) -> (i32, i32) {
    %c0_i32 = arith.constant 0 : i32
    %c0_i32_0 = arith.constant 0 : i32
    %c0_i32_1 = arith.constant 0 : i32
    return %c0_i32, %c0_i32_0 : i32, i32
  }
  func.func @transform_3(%arg0: i32) -> (i32, i32) {
    %c0_i32 = arith.constant 0 : i32
    %c0_i32_0 = arith.constant 0 : i32
    %c0_i32_1 = arith.constant 0 : i32
    return %c0_i32, %c0_i32_0 : i32, i32
  }
  func.func @transform_4(%arg0: i32) -> (i32, i32) {
    %c0_i32 = arith.constant 0 : i32
    %c0_i32_0 = arith.constant 0 : i32
    %c0_i32_1 = arith.constant 0 : i32
    return %c0_i32, %c0_i32_0 : i32, i32
  }
  func.func @transform_5(%arg0: i32) -> (i32, i32) {
    %c0_i32 = arith.constant 0 : i32
    %c0_i32_0 = arith.constant 0 : i32
    %c0_i32_1 = arith.constant 0 : i32
    return %c0_i32, %c0_i32_0 : i32, i32
  }
  func.func @transform_6(%arg0: i32) -> (i32, i32) {
    %c0_i32 = arith.constant 0 : i32
    %c0_i32_0 = arith.constant 0 : i32
    %c0_i32_1 = arith.constant 0 : i32
    return %c0_i32, %c0_i32_0 : i32, i32
  }
  func.func @transform_7(%arg0: i32) -> (i32, i32) {
    %c0_i32 = arith.constant 0 : i32
    %c0_i32_0 = arith.constant 0 : i32
    return %arg0, %c0_i32 : i32, i32
  }
}

</mosaic_0001>

<bundles_post_ra>
// kernel: tpu_custom_call.1
= control target key start
LH: loop header
LB: loop body
LE: loop exit
PB: predicated region body
PF: predicated region fallthrough
CT: control target
= control target key end

     0   :  { %s1619_s26 = smov 0   ;;  %s2044_s0 = inlined_call_operand.vmem [shape: f32[208,8], index: 0, kind: input, shape index: {}]   ;;  %s2045_s1 = inlined_call_operand.vmem [shape: f32[8,48], index: 1, kind: input, shape index: {}]   ;;  %s2046_s2 = inlined_call_operand.vmem [shape: f32[1,48], index: 2, kind: input, shape index: {}]   ;;  %s2047_s3 = inlined_call_operand.vmem [shape: f32[48,20], index: 3, kind: input, shape index: {}]   ;;  %s2048_s4 = inlined_call_operand.vmem [shape: f32[1,20], index: 4, kind: input, shape index: {}]   ;;  %s2049_s5 = inlined_call_operand.vmem [shape: f32[20,1], index: 5, kind: input, shape index: {}]   ;;  %s2050_s6 = inlined_call_operand.<no memory space> [shape: f32[1,1], index: 6, kind: input, shape index: {}]   ;;  %s2051_s7 = inlined_call_operand.vmem [shape: f32[208,1], index: 7, kind: output, shape index: {}]  }
   0x1   :  { %v12_v0 = vstv %s2050_s6 }
   0x2   :  { %13 = vst [vmem:[#allocation2] sm:$0x1] %v12_v0 }
   0x3 LB: > { %s1198_s27 = sadd.s32 4294967295, %s1571_s26   ;;  %p1202_p0 = scmp.ge.s32.totalorder %s1571_s26, 1  ;;  %s1571_s26 = sphi %s1619_s26, %s19_s26  }
   0x4   : > { %p240_p1 = scmp.lt.s32.totalorder %s1571_s26, 3 }
   0x6   : > { %p241_p2 = pnand %p1202_p0, %p240_p1 }
   0x7   : > { %v297_v1 = vld [vmem:[%s2045_s1] sm:$0xff] (!%p241_p2)  ;;  %s272_s6 = smul.u32 (!%p241_p2), 13, %s1198_s27  ;;  %v1573_v2 = vmov (!%p241_p2), 0.0   ;;  %vm1574_vm0 = vmmov (!%p241_p2), 0   ;;  %vm305_vm1 = vcmask (!%p241_p2), 64512   ;;  %v619_v17 = vld [vmem:[%s2047_s3 + $0x8] sm:$0xff] (!%p241_p2) }
   0x8   : > { %244 = sbr.rel (%p241_p2) target bundleno = 786 (0x312), region = 48  ;;  %1299 = vmatprep.subr.mxu0 (!%p241_p2), %v1573_v2  ;;  %1448 = vmatprep.subr.mxu1 (!%p241_p2), %v1573_v2  ;;  %v618_v16 = vld [vmem:[%s2047_s3] sm:$0xff] (!%p241_p2)  ;;  %v1575_v18 = vmov (!%p241_p2), 0.0|0.0   ;;  %v620_v20 = vld [vmem:[%s2047_s3 + $0x10] sm:$0xff] (!%p241_p2)  ;;  %v621_v21 = vld [vmem:[%s2047_s3 + $0x18] sm:$0xff] (!%p241_p2)  ;;  %vm631_vm3 = vcmask (!%p241_p2), 392192  }
   0x9   : > { %1300 = vmatpush3.msra.mxu0 (!%p241_p2), %v297_v1  ;;  %1449 = vmatpush3.msra.mxu1 (!%p241_p2), %v297_v1  ;;  %p273_p3 = scmp.lt.s32.totalorder (!%p241_p2), %s272_s6, 25  ;;  %v1437_v19 = vpack.c.bf16 (!%p241_p2), %v619_v17, %v618_v16  ;;  %v1440_v22 = vpack.c.bf16 (!%p241_p2), %v621_v21, %v620_v20  ;;  %v622_v23 = vld [vmem:[%s2047_s3 + $0x20] sm:$0xff] (!%p241_p2)  ;;  %v623_v24 = vld [vmem:[%s2047_s3 + $0x28] sm:$0xff] (!%p241_p2) }
   0xa   : > { %1301 = vmatprep.mubr.msk.f32.mxu0 (!%p241_p2), %vm1574_vm0, %v1573_v2  ;;  %1322 = vmatprep.mubr.msk.f32.mxu1 (!%p241_p2), %vm1574_vm0, %v1573_v2  ;;  %v1443_v25 = vpack.c.bf16 (!%p241_p2), %v623_v24, %v622_v23  ;;  %v1719_v26 = vld [vmem:[%s2046_s2] ss:$0 sm:$0xff] (!%p241_p2) }
   0xb   : > { %1436 = vmatprep.subr.bf16.mxu1 (!%p241_p2), %v1575_v18  ;;  %1445 = vmatprep.subr.bf16.mxu0 (!%p241_p2), %v1575_v18 }
   0xf   : > { %s2053_s6 = smov (!%p273_p3, %s272_s6), 25 }
  0x10   : > { %s1203_s30 = sshll.u32 %s2053_s6, 3 }
  0x11   : > { %s1644_s10 = scalar_lea.vmem %s2044_s0, %s1203_s30  ;;  %s2013_s14 = scalar_lea.vmem %s2051_s7, %s1203_s30 }
  0x12   : > { %v284_v3 = vld [vmem:[%s1644_s10] sm:$0xff]  ;;  %v291_v4 = vld [vmem:[%s1644_s10 + $0x38] sm:$0xff]  ;;  %v285_v5 = vld [vmem:[%s1644_s10 + $0x8] sm:$0xff] }
  0x13   : > { %1302 = vmatmul.mubr.msk.f32.vlgmr.msra.gmra.mrb[0].mxu0 %vm305_vm1, %v284_v3  ;;  %1323 = vmatmul.mubr.msk.f32.vlgmr.msra.gmra.mrb[0].mxu1 %vm305_vm1, %v291_v4  ;;  %v292_v6 = vld [vmem:[%s1644_s10 + $0x40] sm:$0xff]  ;;  %v286_v7 = vld [vmem:[%s1644_s10 + $0x10] sm:$0xff]  ;;  %v293_v8 = vld [vmem:[%s1644_s10 + $0x48] sm:$0xff] }
  0x14   : > { %1304 = vmatprep.mubr.msk.f32.mxu0 %vm1574_vm0, %v1573_v2  ;;  %1325 = vmatprep.mubr.msk.f32.mxu1 %vm1574_vm0, %v1573_v2  ;;  %v287_v9 = vld [vmem:[%s1644_s10 + $0x18] sm:$0xff]  ;;  %v294_v10 = vld [vmem:[%s1644_s10 + $0x50] sm:$0xff]  ;;  %v288_v11 = vld [vmem:[%s1644_s10 + $0x20] sm:$0xff] }
  0x15   : > { %v295_v12 = vld [vmem:[%s1644_s10 + $0x58] sm:$0xff]  ;;  %v289_v13 = vld [vmem:[%s1644_s10 + $0x28] sm:$0xff]  ;;  %v296_v14 = vld [vmem:[%s1644_s10 + $0x60] sm:$0xff]  ;;  %1438 = vmatpush3.bf16.msra.mxu1 %v1437_v19 }
  0x16   : > { %v290_v15 = vld [vmem:[%s1644_s10 + $0x30] sm:$0xff]  ;;  %1439 = vmatprep.subr.bf16.mxu1 %v1575_v18 }
  0x17   : > { %1305 = vmatmul.mubr.msk.f32.gmra.mrb[2].mxu0 %vm305_vm1, %v285_v5  ;;  %1326 = vmatmul.mubr.msk.f32.gmra.mrb[2].mxu1 %vm305_vm1, %v292_v6 }
  0x18   : > { %1307 = vmatprep.mubr.msk.f32.mxu0 %vm1574_vm0, %v1573_v2  ;;  %1328 = vmatprep.mubr.msk.f32.mxu1 %vm1574_vm0, %v1573_v2 }
  0x19   : > { %1441 = vmatpush3.bf16.msra.mxu1 %v1440_v22 }
  0x1a   : > { %1442 = vmatprep.subr.bf16.mxu1 %v1575_v18 }
  0x1b   : > { %1308 = vmatmul.mubr.msk.f32.gmra.mrb[4].mxu0 %vm305_vm1, %v286_v7  ;;  %1329 = vmatmul.mubr.msk.f32.gmra.mrb[4].mxu1 %vm305_vm1, %v293_v8 }
  0x1c   : > { %1310 = vmatprep.mubr.msk.f32.mxu0 %vm1574_vm0, %v1573_v2  ;;  %1331 = vmatprep.mubr.msk.f32.mxu1 %vm1574_vm0, %v1573_v2 }
  0x1d   : > { %1444 = vmatpush3.bf16.msra.mxu1 %v1443_v25 }
  0x1f   : > { %1311 = vmatmul.mubr.msk.f32.gmra.mrb[6].mxu0 %vm305_vm1, %v287_v9  ;;  %1332 = vmatmul.mubr.msk.f32.gmra.mrb[6].mxu1 %vm305_vm1, %v294_v10 }
  0x20   : > { %1313 = vmatprep.mubr.msk.f32.mxu0 %vm1574_vm0, %v1573_v2  ;;  %1334 = vmatprep.mubr.msk.f32.mxu1 %vm1574_vm0, %v1573_v2 }
  0x23   : > { %1314 = vmatmul.mubr.msk.f32.gmra.mrb[8].mxu0 %vm305_vm1, %v288_v11  ;;  %1335 = vmatmul.mubr.msk.f32.gmra.mrb[8].mxu1 %vm305_vm1, %v295_v12 }
  0x24   : > { %1316 = vmatprep.mubr.msk.f32.mxu0 %vm1574_vm0, %v1573_v2  ;;  %1337 = vmatprep.mubr.msk.f32.mxu1 %vm1574_vm0, %v1573_v2 }
  0x27   : > { %1317 = vmatmul.mubr.msk.f32.gmra.mrb[10].mxu0 %vm305_vm1, %v289_v13  ;;  %1338 = vmatmul.mubr.msk.f32.gmra.mrb[10].mxu1 %vm305_vm1, %v296_v14 }
  0x28   : > { %1319 = vmatprep.mubr.msk.f32.mxu0 %vm1574_vm0, %v1573_v2  ;;  %1352 = vmatprep.mubr.msk.f32.mxu1 %vm1574_vm0, %v1573_v2 }
  0x2b   : > { %1320 = vmatmul.mubr.msk.f32.gmra.mrb[12].mxu0 %vm305_vm1, %v290_v15  ;;  %vm994_vm1 = vcmask 1043456  }
  0x2c   : > { %1397 = vmatprep.mubr.msk.f32.mxu0 %vm1574_vm0, %v1573_v2 }
  0xe6   : > { %v411_v27 = vpop.f32.mrb[0].mxu0  ;;  %v446_v28 = vpop.f32.mrb[0].mxu1 }
  0xe7   : > { %v1722_v29 = vadd.f32 %v1719_v26, %v411_v27  ;;  %v1303_v30 = vpop.f32.mrb[1].mxu0  ;;  %v1324_v31 = vpop.f32.mrb[1].mxu1  ;;  %v1733_v46 = vadd.f32 %v1719_v26, %v446_v28 }
  0xe9   : > { %v475_v32 = vmin.f32 %v1722_v29, 20.0  ;;  %v482_v54 = vmin.f32 %v1733_v46, 20.0  ;;  %vm579_vm2 = vcmp.gt.f32.partialorder %v1722_v29, 20.0  ;;  %vm586_vm10 = vcmp.gt.f32.partialorder %v1733_v46, 20.0 }
  0xea   : > { %v416_v33 = vpop.f32.mrb[2].mxu0  ;;  %v451_v34 = vpop.f32.mrb[2].mxu1 }
  0xeb   : > { %v488_v35 = vmul.f32 1.442695, %v475_v32  ;;  %v1726_v36 = vadd.f32 %v1719_v26, %v416_v33  ;;  %v1306_v37 = vpop.f32.mrb[3].mxu0  ;;  %v1327_v38 = vpop.f32.mrb[3].mxu1  ;;  %v1741_v55 = vadd.f32 %v1719_v26, %v451_v34  ;;  %v502_v3 = vmul.f32 1.442695, %v482_v54 }
  0xed   : > { %1461 = vpow2.f32 %v488_v35  ;;  %v476_v39 = vmin.f32 %v1726_v36, 20.0  ;;  %v483_v4 = vmin.f32 %v1741_v55, 20.0  ;;  %vm580_vm4 = vcmp.gt.f32.partialorder %v1726_v36, 20.0 }
  0xee   : > { %v421_v40 = vpop.f32.mrb[4].mxu0  ;;  %v456_v41 = vpop.f32.mrb[4].mxu1  ;;  %vm587_vm11 = vcmp.gt.f32.partialorder %v1741_v55, 20.0 }
  0xef   : > { %v490_v42 = vmul.f32 1.442695, %v476_v39  ;;  %v1730_v43 = vadd.f32 %v1719_v26, %v421_v40  ;;  %v1309_v44 = vpop.f32.mrb[5].mxu0  ;;  %v1330_v45 = vpop.f32.mrb[5].mxu1  ;;  %v1745_v57 = vadd.f32 %v1719_v26, %v456_v41  ;;  %v504_v17 = vmul.f32 1.442695, %v483_v4 }
  0xf1   : > { %1463 = vpow2.f32 %v490_v42  ;;  %v477_v47 = vmin.f32 %v1730_v43, 20.0  ;;  %v484_v7 = vmin.f32 %v1745_v57, 20.0  ;;  %vm581_vm5 = vcmp.gt.f32.partialorder %v1730_v43, 20.0 }
  0xf2   : > { %v426_v48 = vpop.f32.mrb[6].mxu0  ;;  %v461_v49 = vpop.f32.mrb[6].mxu1  ;;  %vm588_vm12 = vcmp.gt.f32.partialorder %v1745_v57, 20.0 }
  0xf3   : > { %v492_v50 = vmul.f32 1.442695, %v477_v47  ;;  %v1737_v51 = vadd.f32 %v1719_v26, %v426_v48  ;;  %v1312_v52 = vpop.f32.mrb[7].mxu0  ;;  %v1333_v53 = vpop.f32.mrb[7].mxu1  ;;  %v1754_v11 = vadd.f32 %v1719_v26, %v461_v49  ;;  %v506_v20 = vmul.f32 1.442695, %v484_v7 }
  0xf5   : > { %1465 = vpow2.f32 %v492_v50  ;;  %v478_v56 = vmin.f32 %v1737_v51, 20.0  ;;  %v485_v24 = vmin.f32 %v1754_v11, 20.0  ;;  %vm582_vm6 = vcmp.gt.f32.partialorder %v1737_v51, 20.0 }
  0xf6   : > { %v431_v58 = vpop.f32.mrb[8].mxu0  ;;  %v466_v59 = vpop.f32.mrb[8].mxu1  ;;  %vm589_vm13 = vcmp.gt.f32.partialorder %v1754_v11, 20.0 }
  0xf7   : > { %v1462_v60 = vpop.eup %1461  ;;  %v494_v61 = vmul.f32 1.442695, %v478_v56  ;;  %v1748_v62 = vadd.f32 %v1719_v26, %v431_v58  ;;  %v1315_v63 = vpop.f32.mrb[9].mxu0  ;;  %v1765_v30 = vadd.f32 %v1719_v26, %v466_v59  ;;  %v508_v37 = vmul.f32 1.442695, %v485_v24 }
  0xf8   : > { %v1336_v0 = vpop.f32.mrb[9].mxu1  ;;  %v514_v1 = vadd.f32 2.0, %v1462_v60 }
  0xf9   : > { %1467 = vpow2.f32 %v494_v61  ;;  %v479_v5 = vmin.f32 %v1748_v62, 20.0  ;;  %v486_v39 = vmin.f32 %v1765_v30, 20.0  ;;  %vm583_vm7 = vcmp.gt.f32.partialorder %v1748_v62, 20.0 }
  0xfa   : > { %v527_v6 = vmul.f32 %v1462_v60, %v514_v1  ;;  %v436_v8 = vpop.f32.mrb[10].mxu0  ;;  %v471_v9 = vpop.f32.mrb[10].mxu1  ;;  %1469 = vpow2.f32 %v502_v3  ;;  %vm590_vm14 = vcmp.gt.f32.partialorder %v1765_v30, 20.0 }
  0xfb   : > { %v1464_v10 = vpop.eup %1463  ;;  %v496_v12 = vmul.f32 1.442695, %v479_v5  ;;  %v1757_v13 = vadd.f32 %v1719_v26, %v436_v8  ;;  %v1318_v14 = vpop.f32.mrb[11].mxu0  ;;  %v1770_v40 = vadd.f32 %v1719_v26, %v471_v9  ;;  %v510_v49 = vmul.f32 1.442695, %v486_v39 }
  0xfc   : > { %v1339_v15 = vpop.f32.mrb[11].mxu1  ;;  %v540_v16 = vadd.f32 2.0, %v527_v6  ;;  %v515_v18 = vadd.f32 2.0, %v1464_v10 }
  0xfd   : > { %1471 = vpow2.f32 %v496_v12  ;;  %v480_v19 = vmin.f32 %v1757_v13, 20.0  ;;  %v487_v50 = vmin.f32 %v1770_v40, 20.0  ;;  %vm584_vm8 = vcmp.gt.f32.partialorder %v1757_v13, 20.0 }
  0xfe   : > { %1473 = vrcp.f32 %v540_v16  ;;  %v441_v21 = vpop.f32.mrb[12].mxu0  ;;  %v528_v22 = vmul.f32 %v1464_v10, %v515_v18  ;;  %vm591_vm15 = vcmp.gt.f32.partialorder %v1770_v40, 20.0 }
  0xff   : > { %v1466_v23 = vpop.eup %1465  ;;  %v498_v25 = vmul.f32 1.442695, %v480_v19  ;;  %v1762_v27 = vadd.f32 %v1719_v26, %v441_v21  ;;  %v1321_v28 = vpop.f32.mrb[13].mxu0  ;;  %1475 = vpow2.f32 %v504_v17  ;;  %v512_v63 = vmul.f32 1.442695, %v487_v50 }
 0x100   : > { %v541_v31 = vadd.f32 2.0, %v528_v22  ;;  %v516_v32 = vadd.f32 2.0, %v1466_v23 }
 0x101   : > { %1477 = vpow2.f32 %v498_v25  ;;  %v481_v33 = vmin.f32 %v1762_v27, 20.0  ;;  %vm585_vm9 = vcmp.gt.f32.partialorder %v1762_v27, 20.0 }
 0x102   : > { %1479 = vpow2.f32 %v506_v20  ;;  %v529_v34 = vmul.f32 %v1466_v23, %v516_v32 }
 0x103   : > { %v1468_v35 = vpop.eup %1467  ;;  %v500_v38 = vmul.f32 1.442695, %v481_v33  ;;  %1481 = vrcp.f32 %v541_v31 }
 0x104   : > { %v542_v41 = vadd.f32 2.0, %v529_v34  ;;  %v517_v42 = vadd.f32 2.0, %v1468_v35  ;;  %v1470_v44 = vpop.eup %1469 }
 0x105   : > { %1483 = vpow2.f32 %v500_v38  ;;  %v521_v56 = vadd.f32 2.0, %v1470_v44 }
 0x106   : > { %1485 = vrcp.f32 %v542_v41  ;;  %v530_v45 = vmul.f32 %v1468_v35, %v517_v42 }
 0x107   : > { %v1472_v47 = vpop.eup %1471  ;;  %1487 = vpow2.f32 %v508_v37  ;;  %v1776_v5 = vmul.f32 %v1470_v44, %v521_v56 }
 0x108   : > { %v1474_v48 = vpop.eup %1473  ;;  %v543_v52 = vadd.f32 2.0, %v530_v45  ;;  %v518_v53 = vadd.f32 2.0, %v1472_v47 }
 0x109   : > { %v554_v54 = vmul.f32 %v1474_v48, %v527_v6  ;;  %v1476_v58 = vpop.eup %1475  ;;  %v547_v18 = vadd.f32 2.0, %v1776_v5 }
 0x10a   : > { %1489 = vrcp.f32 %v543_v52  ;;  %v531_v26 = vmul.f32 %v1472_v47, %v518_v53  ;;  %v522_v6 = vadd.f32 2.0, %v1476_v58 }
 0x10b   : > { %v1478_v59 = vpop.eup %1477  ;;  %v592_v60 = vmul.f32 %v554_v54, %v1722_v29  ;;  %1491 = vpow2.f32 %v510_v49 }
 0x10c   : > { %v1480_v61 = vpop.eup %1479  ;;  %v544_v0 = vadd.f32 2.0, %v531_v26  ;;  %v519_v1 = vadd.f32 2.0, %v1478_v59  ;;  %v1784_v19 = vmul.f32 %v1476_v58, %v522_v6 }
 0x10d   : > { %v1482_v3 = vpop.eup %1481  ;;  %v605_v4 = vsel %vm579_vm2, %v1722_v29, %v592_v60  ;;  %v523_v10 = vadd.f32 2.0, %v1480_v61  ;;  %vm954_vm2 = vcmask 162816  }
 0x10e   : > { %1353 = vmatmul.mubr.msk.f32.vlgmr.msra.gmra.mrb[12].mxu1 %vm631_vm3, %v605_v4  ;;  %v556_v7 = vmul.f32 %v1482_v3, %v528_v22  ;;  %1493 = vrcp.f32 %v544_v0  ;;  %v532_v8 = vmul.f32 %v1478_v59, %v519_v1 }
 0x10f   : > { %v1484_v9 = vpop.eup %1483  ;;  %1355 = vmatprep.mubr.msk.f32.mxu1 %vm1574_vm0, %v1573_v2  ;;  %1495 = vpow2.f32 %v512_v63  ;;  %v536_v25 = vmul.f32 %v1480_v61, %v523_v10 }
 0x110   : > { %v1486_v12 = vpop.eup %1485  ;;  %v593_v14 = vmul.f32 %v556_v7, %v1726_v36  ;;  %v545_v15 = vadd.f32 2.0, %v532_v8  ;;  %v520_v16 = vadd.f32 2.0, %v1484_v9 }
 0x111   : > { %v1488_v29 = vpop.eup %1487  ;;  %v558_v17 = vmul.f32 %v1486_v12, %v529_v34  ;;  %v549_v37 = vadd.f32 2.0, %v536_v25 }
 0x112   : > { %v606_v20 = vsel %vm580_vm4, %v1726_v36, %v593_v14  ;;  %1497 = vrcp.f32 %v545_v15  ;;  %v533_v21 = vmul.f32 %v1484_v9, %v520_v16  ;;  %v524_v28 = vadd.f32 2.0, %v1488_v29 }
 0x113   : > { %1356 = vmatmul.mubr.msk.f32.gmra.mrb[14].mxu1 %vm631_vm3, %v606_v20  ;;  %v594_v22 = vmul.f32 %v558_v17, %v1730_v43  ;;  %1499 = vrcp.f32 %v547_v18  ;;  %v548_v36 = vadd.f32 2.0, %v1784_v19  ;;  %v944_v18 = vld [vmem:[%s2049_s5] sm:$0xff]  ;;  %v946_v20 = vld [vmem:[%s2049_s5 + $0x10] sm:$0xf] }
 0x114   : > { %v1490_v23 = vpop.eup %1489  ;;  %1358 = vmatprep.mubr.msk.f32.mxu1 %vm1574_vm0, %v1573_v2  ;;  %v546_v24 = vadd.f32 2.0, %v533_v21  ;;  %v537_v38 = vmul.f32 %v1488_v29, %v524_v28 }
 0x115   : > { %v607_v31 = vsel %vm581_vm5, %v1730_v43, %v594_v22  ;;  %v560_v32 = vmul.f32 %v1490_v23, %v530_v45  ;;  %v1492_v33 = vpop.eup %1491 }
 0x116   : > { %1501 = vrcp.f32 %v546_v24  ;;  %v525_v41 = vadd.f32 2.0, %v1492_v33  ;;  %v550_v47 = vadd.f32 2.0, %v537_v38 }
 0x117   : > { %1359 = vmatmul.mubr.msk.f32.gmra.mrb[16].mxu1 %vm631_vm3, %v607_v31  ;;  %v595_v34 = vmul.f32 %v560_v32, %v1737_v51  ;;  %1503 = vrcp.f32 %v548_v36 }
 0x118   : > { %v1494_v35 = vpop.eup %1493  ;;  %1361 = vmatprep.mubr.msk.f32.mxu1 %vm1574_vm0, %v1573_v2  ;;  %1505 = vrcp.f32 %v549_v37 }
 0x119   : > { %v608_v43 = vsel %vm582_vm6, %v1737_v51, %v595_v34  ;;  %v562_v39 = vmul.f32 %v1494_v35, %v531_v26  ;;  %v1496_v42 = vpop.eup %1495  ;;  %v538_v51 = vmul.f32 %v1492_v33, %v525_v41  ;;  %1507 = vrcp.f32 %v550_v47 }
 0x11a   : > { %v526_v50 = vadd.f32 2.0, %v1496_v42 }
 0x11b   : > { %1362 = vmatmul.mubr.msk.f32.gmra.mrb[18].mxu1 %vm631_vm3, %v608_v43  ;;  %v596_v44 = vmul.f32 %v562_v39, %v1748_v62  ;;  %v551_v26 = vadd.f32 2.0, %v538_v51 }
 0x11c   : > { %v1498_v45 = vpop.eup %1497  ;;  %1364 = vmatprep.mubr.msk.f32.mxu1 %vm1574_vm0, %v1573_v2 }
 0x11d   : > { %v609_v48 = vsel %vm583_vm7, %v1748_v62, %v596_v44  ;;  %v564_v49 = vmul.f32 %v1498_v45, %v532_v8  ;;  %v1500_v52 = vpop.eup %1499  ;;  %v539_v62 = vmul.f32 %v1496_v42, %v526_v50  ;;  %1509 = vrcp.f32 %v551_v26 }
 0x11e   : > { %v568_v59 = vmul.f32 %v1500_v52, %v1776_v5 }
 0x11f   : > { %1365 = vmatmul.mubr.msk.f32.gmra.mrb[20].mxu1 %vm631_vm3, %v609_v48  ;;  %v597_v53 = vmul.f32 %v564_v49, %v1757_v13  ;;  %v552_v0 = vadd.f32 2.0, %v539_v62 }
 0x120   : > { %v1502_v54 = vpop.eup %1501  ;;  %1367 = vmatprep.mubr.msk.f32.mxu1 %vm1574_vm0, %v1573_v2  ;;  %v599_v1 = vmul.f32 %v568_v59, %v1733_v46 }
 0x121   : > { %v610_v56 = vsel %vm584_vm8, %v1757_v13, %v597_v53  ;;  %v566_v58 = vmul.f32 %v1502_v54, %v533_v21  ;;  %v1504_v60 = vpop.eup %1503  ;;  %1511 = vrcp.f32 %v552_v0 }
 0x122   : > { %v1506_v13 = vpop.eup %1505  ;;  %v570_v3 = vmul.f32 %v1504_v60, %v1784_v19  ;;  %v612_v5 = vsel %vm586_vm10, %v1733_v46, %v599_v1 }
 0x123   : > { %1368 = vmatmul.mubr.msk.f32.gmra.mrb[22].mxu1 %vm631_vm3, %v610_v56  ;;  %v598_v61 = vmul.f32 %v566_v58, %v1762_v27  ;;  %v1508_v4 = vpop.eup %1507  ;;  %v572_v6 = vmul.f32 %v1506_v13, %v536_v25 }
 0x124   : > { %1370 = vmatprep.mubr.msk.f32.mxu1 %vm1574_vm0, %v1573_v2  ;;  %v574_v9 = vmul.f32 %v1508_v4, %v537_v38 }
 0x125   : > { %v611_v63 = vsel %vm585_vm9, %v1762_v27, %v598_v61  ;;  %v600_v27 = vmul.f32 %v570_v3, %v1741_v55  ;;  %v601_v8 = vmul.f32 %v572_v6, %v1745_v57 }
 0x126   : > { %v602_v12 = vmul.f32 %v574_v9, %v1754_v11 }
 0x127   : > { %1371 = vmatmul.mubr.msk.f32.gmra.mrb[24].mxu1 %vm631_vm3, %v611_v63  ;;  %v613_v7 = vsel %vm587_vm11, %v1741_v55, %v600_v27  ;;  %v1510_v10 = vpop.eup %1509  ;;  %v614_v46 = vsel %vm588_vm12, %v1745_v57, %v601_v8 }
 0x128   : > { %1373 = vmatprep.mubr.msk.f32.mxu1 %vm1574_vm0, %v1573_v2  ;;  %v576_v14 = vmul.f32 %v1510_v10, %v538_v51  ;;  %v615_v55 = vsel %vm589_vm13, %v1754_v11, %v602_v12 }
 0x12a   : > { %v603_v16 = vmul.f32 %v576_v14, %v1765_v30 }
 0x12b   : > { %1374 = vmatmul.mubr.msk.f32.gmra.mrb[26].mxu1 %vm631_vm3, %v612_v5  ;;  %v1512_v15 = vpop.eup %1511 }
 0x12c   : > { %1376 = vmatprep.mubr.msk.f32.mxu1 %vm1574_vm0, %v1573_v2  ;;  %v578_v29 = vmul.f32 %v1512_v15, %v539_v62  ;;  %v616_v57 = vsel %vm590_vm14, %v1765_v30, %v603_v16  ;;  %v945_v30 = vld [vmem:[%s2049_s5 + $0x8] sm:$0xff] }
 0x12d   : > { %v1446_v19 = vpack.c.bf16 %v945_v30, %v944_v18 }
 0x12e   : > { %v604_v17 = vmul.f32 %v578_v29, %v1770_v40 }
 0x12f   : > { %1377 = vmatmul.mubr.msk.f32.gmra.mrb[28].mxu1 %vm631_vm3, %v613_v7  ;;  %1447 = vmatpush3.bf16.msra.mxu0 %v1446_v19 }
 0x130   : > { %1379 = vmatprep.mubr.msk.f32.mxu1 %vm1574_vm0, %v1573_v2  ;;  %v617_v11 = vsel %vm591_vm15, %v1770_v40, %v604_v17  ;;  %1395 = vmatprep.subr.mxu0 %v1573_v2  ;;  %v1870_v40 = vld [vmem:[%s2048_s4] ss:$0 sm:$0xff] }
 0x133   : > { %1380 = vmatmul.mubr.msk.f32.gmra.mrb[30].mxu1 %vm631_vm3, %v614_v46  ;;  %1396 = vmatpush3.msk.msra.mxu0 %vm994_vm1, %v946_v20  ;;  %vm1128_vm1 = vcmask 7168  }
 0x134   : > { %1382 = vmatprep.mubr.msk.f32.mxu1 %vm1574_vm0, %v1573_v2 }
 0x137   : > { %1383 = vmatmul.mubr.msk.f32.gmra.mrb[32].mxu1 %vm631_vm3, %v615_v55 }
 0x138   : > { %1385 = vmatprep.mubr.msk.f32.mxu1 %vm1574_vm0, %v1573_v2 }
 0x13b   : > { %1386 = vmatmul.mubr.msk.f32.gmra.mrb[34].mxu1 %vm631_vm3, %v616_v57 }
 0x13c   : > { %1388 = vmatprep.mubr.msk.f32.mxu1 %vm1574_vm0, %v1573_v2 }
 0x13f   : > { %1389 = vmatmul.mubr.msk.f32.gmra.mrb[36].mxu1 %vm631_vm3, %v617_v11 }
 0x1e1   : > { %v737_v21 = vpop.f32.mrb[12].mxu1 }
 0x1e2   : > { %v1873_v22 = vadd.f32 %v1870_v40, %v737_v21  ;;  %v1354_v23 = vpop.f32.mrb[13].mxu1 }
 0x1e4   : > { %v801_v24 = vmin.f32 %v1873_v22, 20.0  ;;  %vm905_vm3 = vcmp.gt.f32.partialorder %v1873_v22, 20.0 }
 0x1e6   : > { %v814_v25 = vmul.f32 1.442695, %v801_v24  ;;  %v742_v28 = vpop.f32.mrb[14].mxu1 }
 0x1e7   : > { %v1877_v31 = vadd.f32 %v1870_v40, %v742_v28  ;;  %v1357_v32 = vpop.f32.mrb[15].mxu1 }
 0x1e8   : > { %1513 = vpow2.f32 %v814_v25 }
 0x1e9   : > { %v802_v36 = vmin.f32 %v1877_v31, 20.0  ;;  %vm906_vm4 = vcmp.gt.f32.partialorder %v1877_v31, 20.0 }
 0x1ea   : > { %v747_v33 = vpop.f32.mrb[16].mxu1 }
 0x1eb   : > { %v816_v34 = vmul.f32 1.442695, %v802_v36  ;;  %v1881_v35 = vadd.f32 %v1870_v40, %v747_v33  ;;  %v1360_v37 = vpop.f32.mrb[17].mxu1 }
 0x1ed   : > { %1515 = vpow2.f32 %v816_v34  ;;  %v803_v38 = vmin.f32 %v1881_v35, 20.0  ;;  %vm907_vm5 = vcmp.gt.f32.partialorder %v1881_v35, 20.0 }
 0x1ee   : > { %v752_v43 = vpop.f32.mrb[18].mxu1 }
 0x1ef   : > { %v818_v39 = vmul.f32 1.442695, %v803_v38  ;;  %v1885_v41 = vadd.f32 %v1870_v40, %v752_v43  ;;  %v1363_v42 = vpop.f32.mrb[19].mxu1 }
 0x1f1   : > { %1517 = vpow2.f32 %v818_v39  ;;  %v804_v44 = vmin.f32 %v1885_v41, 20.0  ;;  %vm908_vm6 = vcmp.gt.f32.partialorder %v1885_v41, 20.0 }
 0x1f2   : > { %v1514_v45 = vpop.eup %1513  ;;  %v757_v47 = vpop.f32.mrb[20].mxu1 }
 0x1f3   : > { %v840_v48 = vadd.f32 2.0, %v1514_v45  ;;  %v820_v49 = vmul.f32 1.442695, %v804_v44  ;;  %v1889_v51 = vadd.f32 %v1870_v40, %v757_v47  ;;  %v1366_v50 = vpop.f32.mrb[21].mxu1 }
 0x1f5   : > { %v853_v52 = vmul.f32 %v1514_v45, %v840_v48  ;;  %1519 = vpow2.f32 %v820_v49  ;;  %v805_v53 = vmin.f32 %v1889_v51, 20.0  ;;  %vm909_vm7 = vcmp.gt.f32.partialorder %v1889_v51, 20.0 }
 0x1f6   : > { %v762_v54 = vpop.f32.mrb[22].mxu1 }
 0x1f7   : > { %v1516_v56 = vpop.eup %1515  ;;  %v866_v58 = vadd.f32 2.0, %v853_v52  ;;  %v822_v26 = vmul.f32 1.442695, %v805_v53  ;;  %v1893_v62 = vadd.f32 %v1870_v40, %v762_v54  ;;  %v1369_v59 = vpop.f32.mrb[23].mxu1 }
 0x1f8   : > { %v841_v60 = vadd.f32 2.0, %v1516_v56 }
 0x1f9   : > { %1521 = vrcp.f32 %v866_v58  ;;  %v806_v61 = vmin.f32 %v1893_v62, 20.0  ;;  %vm910_vm8 = vcmp.gt.f32.partialorder %v1893_v62, 20.0 }
 0x1fa   : > { %1523 = vpow2.f32 %v822_v26  ;;  %v767_v63 = vpop.f32.mrb[24].mxu1  ;;  %v854_v0 = vmul.f32 %v1516_v56, %v841_v60 }
 0x1fb   : > { %v1518_v13 = vpop.eup %1517  ;;  %v824_v1 = vmul.f32 1.442695, %v806_v61  ;;  %v1897_v3 = vadd.f32 %v1870_v40, %v767_v63  ;;  %v1372_v4 = vpop.f32.mrb[25].mxu1 }
 0x1fc   : > { %v867_v5 = vadd.f32 2.0, %v854_v0  ;;  %v842_v27 = vadd.f32 2.0, %v1518_v13 }
 0x1fd   : > { %1525 = vpow2.f32 %v824_v1  ;;  %v807_v6 = vmin.f32 %v1897_v3, 20.0  ;;  %vm911_vm9 = vcmp.gt.f32.partialorder %v1897_v3, 20.0 }
 0x1fe   : > { %v772_v7 = vpop.f32.mrb[26].mxu1  ;;  %1527 = vrcp.f32 %v867_v5  ;;  %v855_v8 = vmul.f32 %v1518_v13, %v842_v27 }
 0x1ff   : > { %v1520_v9 = vpop.eup %1519  ;;  %v826_v10 = vmul.f32 1.442695, %v807_v6  ;;  %v1901_v46 = vadd.f32 %v1870_v40, %v772_v7  ;;  %v1375_v12 = vpop.f32.mrb[27].mxu1 }
 0x200   : > { %v868_v14 = vadd.f32 2.0, %v855_v8  ;;  %v843_v15 = vadd.f32 2.0, %v1520_v9 }
 0x201   : > { %1529 = vpow2.f32 %v826_v10  ;;  %v808_v55 = vmin.f32 %v1901_v46, 20.0  ;;  %vm912_vm10 = vcmp.gt.f32.partialorder %v1901_v46, 20.0 }
 0x202   : > { %v777_v16 = vpop.f32.mrb[28].mxu1  ;;  %1531 = vrcp.f32 %v868_v14  ;;  %v1904_v29 = vmul.f32 %v1520_v9, %v843_v15 }
 0x203   : > { %v1522_v57 = vpop.eup %1521  ;;  %v828_v17 = vmul.f32 1.442695, %v808_v55  ;;  %v1907_v11 = vadd.f32 %v1870_v40, %v777_v16  ;;  %v1378_v18 = vpop.f32.mrb[29].mxu1 }
 0x204   : > { %v1524_v30 = vpop.eup %1523  ;;  %v880_v19 = vmul.f32 %v1522_v57, %v853_v52  ;;  %v869_v20 = vadd.f32 2.0, %v1904_v29 }
 0x205   : > { %1533 = vpow2.f32 %v828_v17  ;;  %v809_v21 = vmin.f32 %v1907_v11, 20.0  ;;  %v844_v23 = vadd.f32 2.0, %v1524_v30  ;;  %vm913_vm11 = vcmp.gt.f32.partialorder %v1907_v11, 20.0 }
 0x206   : > { %v918_v24 = vmul.f32 %v880_v19, %v1873_v22  ;;  %v782_v25 = vpop.f32.mrb[30].mxu1  ;;  %1535 = vrcp.f32 %v869_v20 }
 0x207   : > { %v1526_v28 = vpop.eup %1525  ;;  %v830_v32 = vmul.f32 1.442695, %v809_v21  ;;  %v1914_v36 = vadd.f32 %v1870_v40, %v782_v25  ;;  %v1381_v33 = vpop.f32.mrb[31].mxu1  ;;  %v857_v34 = vmul.f32 %v1524_v30, %v844_v23 }
 0x208   : > { %v1528_v37 = vpop.eup %1527  ;;  %v931_v38 = vsel %vm905_vm3, %v1873_v22, %v918_v24  ;;  %v845_v43 = vadd.f32 2.0, %v1526_v28 }
 0x209   : > { %1537 = vpow2.f32 %v830_v32  ;;  %v810_v39 = vmin.f32 %v1914_v36, 20.0  ;;  %1398 = vmatmul.mubr.msk.f32.vlgmr.msra.gmra.mrb[14].mxu0 %vm954_vm2, %v931_v38  ;;  %v882_v42 = vmul.f32 %v1528_v37, %v854_v0  ;;  %v870_v44 = vadd.f32 2.0, %v857_v34 }
 0x20a   : > { %v787_v45 = vpop.f32.mrb[32].mxu1  ;;  %1400 = vmatprep.mubr.msk.f32.mxu0 %vm1574_vm0, %v1573_v2  ;;  %v1921_v47 = vmul.f32 %v1526_v28, %v845_v43  ;;  %vm914_vm12 = vcmp.gt.f32.partialorder %v1914_v36, 20.0 }
 0x20b   : > { %v1530_v48 = vpop.eup %1529  ;;  %v832_v49 = vmul.f32 1.442695, %v810_v39  ;;  %v1924_v50 = vadd.f32 %v1870_v40, %v787_v45  ;;  %v1384_v22 = vpop.f32.mrb[33].mxu1  ;;  %v919_v52 = vmul.f32 %v882_v42, %v1877_v31  ;;  %1539 = vrcp.f32 %v870_v44 }
 0x20c   : > { %v1532_v53 = vpop.eup %1531  ;;  %v871_v54 = vadd.f32 2.0, %v1921_v47  ;;  %v846_v56 = vadd.f32 2.0, %v1530_v48 }
 0x20d   : > { %1541 = vpow2.f32 %v832_v49  ;;  %v811_v58 = vmin.f32 %v1924_v50, 20.0  ;;  %v932_v26 = vsel %vm906_vm4, %v1877_v31, %v919_v52  ;;  %v884_v59 = vmul.f32 %v1532_v53, %v855_v8 }
 0x20e   : > { %v792_v60 = vpop.f32.mrb[34].mxu1  ;;  %1401 = vmatmul.mubr.msk.f32.gmra.mrb[16].mxu0 %vm954_vm2, %v932_v26  ;;  %1543 = vrcp.f32 %v871_v54  ;;  %v859_v61 = vmul.f32 %v1530_v48, %v846_v56  ;;  %vm915_vm13 = vcmp.gt.f32.partialorder %v1924_v50, 20.0 }
 0x20f   : > { %v1534_v63 = vpop.eup %1533  ;;  %v834_v0 = vmul.f32 1.442695, %v811_v58  ;;  %v1933_v13 = vadd.f32 %v1870_v40, %v792_v60  ;;  %v1387_v1 = vpop.f32.mrb[35].mxu1  ;;  %1403 = vmatprep.mubr.msk.f32.mxu0 %vm1574_vm0, %v1573_v2  ;;  %v920_v4 = vmul.f32 %v884_v59, %v1881_v35 }
 0x210   : > { %v1536_v5 = vpop.eup %1535  ;;  %v872_v31 = vadd.f32 2.0, %v859_v61  ;;  %v847_v27 = vadd.f32 2.0, %v1534_v63 }
 0x211   : > { %1545 = vpow2.f32 %v834_v0  ;;  %v812_v6 = vmin.f32 %v1933_v13, 20.0  ;;  %v933_v7 = vsel %vm907_vm5, %v1881_v35, %v920_v4  ;;  %v886_v8 = vmul.f32 %v1536_v5, %v1904_v29 }
 0x212   : > { %v797_v9 = vpop.f32.mrb[36].mxu1  ;;  %1404 = vmatmul.mubr.msk.f32.gmra.mrb[18].mxu0 %vm954_vm2, %v933_v7  ;;  %1547 = vrcp.f32 %v872_v31  ;;  %v860_v10 = vmul.f32 %v1534_v63, %v847_v27  ;;  %vm916_vm14 = vcmp.gt.f32.partialorder %v1933_v13, 20.0 }
 0x213   : > { %v1538_v12 = vpop.eup %1537  ;;  %v836_v14 = vmul.f32 1.442695, %v812_v6  ;;  %v1944_v15 = vadd.f32 %v1870_v40, %v797_v9  ;;  %v1390_v55 = vpop.f32.mrb[37].mxu1  ;;  %1406 = vmatprep.mubr.msk.f32.mxu0 %vm1574_vm0, %v1573_v2  ;;  %v921_v16 = vmul.f32 %v886_v8, %v1885_v41 }
 0x214   : > { %v873_v35 = vadd.f32 2.0, %v860_v10  ;;  %v848_v29 = vadd.f32 2.0, %v1538_v12  ;;  %v1233_v55 = vld [vmem:[#allocation2] ss:$0 sm:$0xff] }
 0x215   : > { %v1540_v57 = vpop.eup %1539  ;;  %1549 = vpow2.f32 %v836_v14  ;;  %v813_v17 = vmin.f32 %v1944_v15, 20.0  ;;  %v934_v18 = vsel %vm908_vm6, %v1885_v41, %v921_v16  ;;  %vm917_vm15 = vcmp.gt.f32.partialorder %v1944_v15, 20.0 }
 0x216   : > { %1407 = vmatmul.mubr.msk.f32.gmra.mrb[20].mxu0 %vm954_vm2, %v934_v18  ;;  %v888_v40 = vmul.f32 %v1540_v57, %v857_v34  ;;  %1551 = vrcp.f32 %v873_v35  ;;  %v861_v30 = vmul.f32 %v1538_v12, %v848_v29 }
 0x217   : > { %v1542_v19 = vpop.eup %1541  ;;  %v838_v20 = vmul.f32 1.442695, %v813_v17  ;;  %1409 = vmatprep.mubr.msk.f32.mxu0 %vm1574_vm0, %v1573_v2 }
 0x218   : > { %v1544_v21 = vpop.eup %1543  ;;  %v922_v23 = vmul.f32 %v888_v40, %v1889_v51  ;;  %v874_v24 = vadd.f32 2.0, %v861_v30  ;;  %v849_v25 = vadd.f32 2.0, %v1542_v19 }
 0x219   : > { %1553 = vpow2.f32 %v838_v20  ;;  %v890_v41 = vmul.f32 %v1544_v21, %v1921_v47 }
 0x21a   : > { %v935_v28 = vsel %vm909_vm7, %v1889_v51, %v922_v23  ;;  %1555 = vrcp.f32 %v874_v24  ;;  %v862_v32 = vmul.f32 %v1542_v19, %v849_v25 }
 0x21b   : > { %v1546_v33 = vpop.eup %1545  ;;  %1410 = vmatmul.mubr.msk.f32.gmra.mrb[22].mxu0 %vm954_vm2, %v935_v28  ;;  %v923_v34 = vmul.f32 %v890_v41, %v1893_v62 }
 0x21c   : > { %v1548_v37 = vpop.eup %1547  ;;  %1412 = vmatprep.mubr.msk.f32.mxu0 %vm1574_vm0, %v1573_v2  ;;  %v875_v38 = vadd.f32 2.0, %v862_v32  ;;  %v850_v43 = vadd.f32 2.0, %v1546_v33 }
 0x21d   : > { %v936_v39 = vsel %vm910_vm8, %v1893_v62, %v923_v34  ;;  %v892_v42 = vmul.f32 %v1548_v37, %v859_v61 }
 0x21e   : > { %1557 = vrcp.f32 %v875_v38  ;;  %v863_v51 = vmul.f32 %v1546_v33, %v850_v43 }
 0x21f   : > { %v1550_v44 = vpop.eup %1549  ;;  %1413 = vmatmul.mubr.msk.f32.gmra.mrb[24].mxu0 %vm954_vm2, %v936_v39  ;;  %v924_v45 = vmul.f32 %v892_v42, %v1897_v3 }
 0x220   : > { %v1552_v47 = vpop.eup %1551  ;;  %1415 = vmatprep.mubr.msk.f32.mxu0 %vm1574_vm0, %v1573_v2  ;;  %v876_v48 = vadd.f32 2.0, %v863_v51  ;;  %v851_v49 = vadd.f32 2.0, %v1550_v44 }
 0x221   : > { %v937_v22 = vsel %vm911_vm9, %v1897_v3, %v924_v45  ;;  %v894_v52 = vmul.f32 %v1552_v47, %v860_v10 }
 0x222   : > { %1559 = vrcp.f32 %v876_v48  ;;  %v864_v62 = vmul.f32 %v1550_v44, %v851_v49 }
 0x223   : > { %v1554_v53 = vpop.eup %1553  ;;  %1416 = vmatmul.mubr.msk.f32.gmra.mrb[26].mxu0 %vm954_vm2, %v937_v22  ;;  %v925_v54 = vmul.f32 %v894_v52, %v1901_v46 }
 0x224   : > { %v1556_v56 = vpop.eup %1555  ;;  %1418 = vmatprep.mubr.msk.f32.mxu0 %vm1574_vm0, %v1573_v2  ;;  %v877_v58 = vadd.f32 2.0, %v864_v62  ;;  %v852_v26 = vadd.f32 2.0, %v1554_v53 }
 0x225   : > { %v938_v59 = vsel %vm912_vm10, %v1901_v46, %v925_v54  ;;  %v896_v60 = vmul.f32 %v1556_v56, %v861_v30 }
 0x226   : > { %1561 = vrcp.f32 %v877_v58  ;;  %v865_v3 = vmul.f32 %v1554_v53, %v852_v26 }
 0x227   : > { %1419 = vmatmul.mubr.msk.f32.gmra.mrb[28].mxu0 %vm954_vm2, %v938_v59  ;;  %v926_v61 = vmul.f32 %v896_v60, %v1907_v11 }
 0x228   : > { %v1558_v63 = vpop.eup %1557  ;;  %1421 = vmatprep.mubr.msk.f32.mxu0 %vm1574_vm0, %v1573_v2  ;;  %v878_v0 = vadd.f32 2.0, %v865_v3 }
 0x229   : > { %v939_v1 = vsel %vm913_vm11, %v1907_v11, %v926_v61  ;;  %v898_v4 = vmul.f32 %v1558_v63, %v862_v32 }
 0x22a   : > { %1563 = vrcp.f32 %v878_v0 }
 0x22b   : > { %1422 = vmatmul.mubr.msk.f32.gmra.mrb[30].mxu0 %vm954_vm2, %v939_v1  ;;  %v927_v46 = vmul.f32 %v898_v4, %v1914_v36 }
 0x22c   : > { %v1560_v5 = vpop.eup %1559  ;;  %1424 = vmatprep.mubr.msk.f32.mxu0 %vm1574_vm0, %v1573_v2 }
 0x22d   : > { %v940_v31 = vsel %vm914_vm12, %v1914_v36, %v927_v46  ;;  %v900_v27 = vmul.f32 %v1560_v5, %v863_v51 }
 0x22f   : > { %1425 = vmatmul.mubr.msk.f32.gmra.mrb[32].mxu0 %vm954_vm2, %v940_v31  ;;  %v928_v6 = vmul.f32 %v900_v27, %v1924_v50 }
 0x230   : > { %v1562_v11 = vpop.eup %1561  ;;  %1427 = vmatprep.mubr.msk.f32.mxu0 %vm1574_vm0, %v1573_v2 }
 0x231   : > { %v941_v7 = vsel %vm915_vm13, %v1924_v50, %v928_v6  ;;  %v902_v8 = vmul.f32 %v1562_v11, %v864_v62 }
 0x233   : > { %1428 = vmatmul.mubr.msk.f32.gmra.mrb[34].mxu0 %vm954_vm2, %v941_v7  ;;  %v929_v9 = vmul.f32 %v902_v8, %v1933_v13 }
 0x234   : > { %v1564_v36 = vpop.eup %1563  ;;  %1430 = vmatprep.mubr.msk.f32.mxu0 %vm1574_vm0, %v1573_v2 }
 0x235   : > { %v942_v10 = vsel %vm916_vm14, %v1933_v13, %v929_v9  ;;  %v904_v12 = vmul.f32 %v1564_v36, %v865_v3 }
 0x237   : > { %1431 = vmatmul.mubr.msk.f32.gmra.mrb[36].mxu0 %vm954_vm2, %v942_v10  ;;  %v930_v14 = vmul.f32 %v904_v12, %v1944_v15 }
 0x238   : > { %1433 = vmatprep.mubr.msk.f32.mxu0 %vm1574_vm0, %v1573_v2 }
 0x239   : > { %v943_v50 = vsel %vm917_vm15, %v1944_v15, %v930_v14 }
 0x23b   : > { %1434 = vmatmul.mubr.msk.f32.gmra.mrb[38].mxu0 %vm954_vm2, %v943_v50 }
 0x2dc   : > { %v1064_v13 = vpop.f32.mrb[14].mxu0 }
 0x2dd   : > { %v1065_v2 = vadd.f32 %v1233_v55, %v1064_v13  ;;  %v1399_v16 = vpop.f32.mrb[15].mxu0 }
 0x2df   : > { %1129 = vst.msk [vmem:[%s2013_s14] sm:$0xff] %vm1128_vm1, %v1065_v2 }
 0x2e1   : > { %v1069_v15 = vpop.f32.mrb[16].mxu0 }
 0x2e2   : > { %v1070_v35 = vadd.f32 %v1233_v55, %v1069_v15  ;;  %v1402_v29 = vpop.f32.mrb[17].mxu0 }
 0x2e4   : > { %1130 = vst.msk [vmem:[%s2013_s14 + $0x8] sm:$0xff] %vm1128_vm1, %v1070_v35 }
 0x2e5   : > { %v1074_v57 = vpop.f32.mrb[18].mxu0 }
 0x2e6   : > { %v1075_v17 = vadd.f32 %v1233_v55, %v1074_v57  ;;  %v1405_v18 = vpop.f32.mrb[19].mxu0 }
 0x2e8   : > { %1131 = vst.msk [vmem:[%s2013_s14 + $0x10] sm:$0xff] %vm1128_vm1, %v1075_v17 }
 0x2e9   : > { %v1079_v40 = vpop.f32.mrb[20].mxu0 }
 0x2ea   : > { %v1080_v30 = vadd.f32 %v1233_v55, %v1079_v40  ;;  %v1408_v19 = vpop.f32.mrb[21].mxu0 }
 0x2ec   : > { %1132 = vst.msk [vmem:[%s2013_s14 + $0x18] sm:$0xff] %vm1128_vm1, %v1080_v30 }
 0x2ee   : > { %v1084_v20 = vpop.f32.mrb[22].mxu0 }
 0x2ef   : > { %v1085_v21 = vadd.f32 %v1233_v55, %v1084_v20  ;;  %v1411_v23 = vpop.f32.mrb[23].mxu0 }
 0x2f1   : > { %1133 = vst.msk [vmem:[%s2013_s14 + $0x20] sm:$0xff] %vm1128_vm1, %v1085_v21 }
 0x2f2   : > { %v1089_v24 = vpop.f32.mrb[24].mxu0 }
 0x2f3   : > { %v1090_v25 = vadd.f32 %v1233_v55, %v1089_v24  ;;  %v1414_v41 = vpop.f32.mrb[25].mxu0 }
 0x2f5   : > { %1134 = vst.msk [vmem:[%s2013_s14 + $0x28] sm:$0xff] %vm1128_vm1, %v1090_v25 }
 0x2f6   : > { %v1094_v28 = vpop.f32.mrb[26].mxu0 }
 0x2f7   : > { %v1095_v32 = vadd.f32 %v1233_v55, %v1094_v28  ;;  %v1417_v33 = vpop.f32.mrb[27].mxu0 }
 0x2f9   : > { %1135 = vst.msk [vmem:[%s2013_s14 + $0x30] sm:$0xff] %vm1128_vm1, %v1095_v32 }
 0x2fa   : > { %v1099_v34 = vpop.f32.mrb[28].mxu0 }
 0x2fb   : > { %v1100_v37 = vadd.f32 %v1233_v55, %v1099_v34  ;;  %v1420_v38 = vpop.f32.mrb[29].mxu0 }
 0x2fd   : > { %1136 = vst.msk [vmem:[%s2013_s14 + $0x38] sm:$0xff] %vm1128_vm1, %v1100_v37 }
 0x2fe   : > { %v1104_v43 = vpop.f32.mrb[30].mxu0 }
 0x2ff   : > { %v1105_v39 = vadd.f32 %v1233_v55, %v1104_v43  ;;  %v1423_v42 = vpop.f32.mrb[31].mxu0 }
 0x301   : > { %1137 = vst.msk [vmem:[%s2013_s14 + $0x40] sm:$0xff] %vm1128_vm1, %v1105_v39 }
 0x302   : > { %v1109_v51 = vpop.f32.mrb[32].mxu0 }
 0x303   : > { %v1110_v44 = vadd.f32 %v1233_v55, %v1109_v51  ;;  %v1426_v45 = vpop.f32.mrb[33].mxu0 }
 0x305   : > { %1138 = vst.msk [vmem:[%s2013_s14 + $0x48] sm:$0xff] %vm1128_vm1, %v1110_v44 }
 0x306   : > { %v1114_v47 = vpop.f32.mrb[34].mxu0 }
 0x307   : > { %v1115_v48 = vadd.f32 %v1233_v55, %v1114_v47  ;;  %v1429_v49 = vpop.f32.mrb[35].mxu0 }
 0x309   : > { %1139 = vst.msk [vmem:[%s2013_s14 + $0x50] sm:$0xff] %vm1128_vm1, %v1115_v48 }
 0x30a   : > { %v1119_v22 = vpop.f32.mrb[36].mxu0 }
 0x30b   : > { %v1120_v52 = vadd.f32 %v1233_v55, %v1119_v22  ;;  %v1432_v62 = vpop.f32.mrb[37].mxu0 }
 0x30d   : > { %1140 = vst.msk [vmem:[%s2013_s14 + $0x58] sm:$0xff] %vm1128_vm1, %v1120_v52 }
 0x30e   : > { %v1124_v53 = vpop.f32.mrb[38].mxu0 }
 0x30f   : > { %v1125_v54 = vadd.f32 %v1233_v55, %v1124_v53  ;;  %v1435_v56 = vpop.f32.mrb[39].mxu0 }
 0x311   : > { %1141 = vst.msk [vmem:[%s2013_s14 + $0x60] sm:$0xff] %vm1128_vm1, %v1125_v54 }
 0x312 PF: > { %s19_s26 = sadd.s32 1, %s1571_s26  }
 0x313   : > { %p16_p4 = scmp.ge.s32.totalorder %s19_s26, 4  }
 0x315   :  { %18 = sbr.rel (!%p16_p4) target bundleno = 3 (0x3), region = 78 }

</bundles_post_ra>
